<compile_context>
chip_gen: v7x
topology: tpu7x:2x2x1
jax: 0.10.0
libtpu: 0.0.40
codegen_flags: <defaults>
</compile_context>

<pallas_src>
from functools import partial

import jax
import jax.numpy as jnp
from jax.experimental import pallas as pl
from jax.experimental.pallas import tpu as pltpu


def _patch_embed_kernel(x_ref, w_ref, b_ref, o_ref):
    # x_ref: (tm, K) bf16 patches, w_ref: (K, tn) bf16, b_ref: (1, tn) f32,
    # o_ref: (tm, tn).  f32 accumulation on the MXU, bias added in f32.
    acc = jnp.dot(x_ref[...], w_ref[...], preferred_element_type=jnp.float32)
    o_ref[...] = (acc + b_ref[...]).astype(o_ref.dtype)


def _round_up(v, m):
    return ((v + m - 1) // m) * m


@partial(jax.jit, static_argnames=("patch_size", "out_dtype"))
def patch_embed_forward(x, weight, bias, *, patch_size, out_dtype=jnp.bfloat16):
    """x: (B, C, H, W); weight: (E, C, ph, pw); bias: (E,) -> (B, nh*nw, E)."""
    B, C, H, W = x.shape
    E = weight.shape[0]
    ph, pw = patch_size
    assert H % ph == 0 and W % pw == 0
    nh, nw = H // ph, W // pw
    num_patches = nh * nw
    K = C * ph * pw
    M = B * num_patches

    compute_dtype = jnp.bfloat16
    out_dtype = jnp.dtype(out_dtype)
    out_isz = out_dtype.itemsize

    # Patchify in (c, dy, dx) K-order (identical to the flattened Conv2d weight
    # layout).  Cast to bf16 first so any materialized intermediate is halved;
    # allow_input_fusion on operand 0 lets XLA fuse this producer into the
    # pallas_call so the (M, K) patches buffer is ideally never written to HBM.
    # TODO(synk): if XLA declines the fusion this is still one bf16 round trip;
    # a fully in-kernel patchify needs lane-splitting reshapes that Mosaic does
    # not lower reliably for small patch widths.
    patches = x.astype(compute_dtype).reshape(B, C, nh, ph, nw, pw)
    patches = patches.transpose(0, 2, 4, 1, 3, 5).reshape(M, K)

    # Conv weight flattened to (K, E) so out = patches @ w_flat + bias.
    w_flat = weight.reshape(E, K).T.astype(compute_dtype)
    b_row = bias.reshape(1, E).astype(jnp.float32)

    # ---- Tiling -----------------------------------------------------------
    vmem_budget = 24 << 20  # double-buffered working-set target (fits v7x 64 MiB)

    # E axis: single full-width tile (tn == E).  Full-dim blocks are legal for
    # any E (no padding / no post-kernel slice pass) and keep weight + bias
    # VMEM-resident across the whole M sweep (grid j == 1 => never re-fetched).
    tn = E
    # Fallback split only if the weight tile alone would blow the budget
    # (does not trigger for realistic PatchEmbed shapes).  Note: with grid
    # j > 1 the weight block is re-fetched every step (j is innermost).
    while tn > 256 and 2 * (K * tn * 2) > vmem_budget // 2:
        tn = _round_up(pl.cdiv(tn, 2), 128)

    # M axis: big tiles (per-step overhead / DMA latency dominate when K is
    # small), but at least two blocks so both v7x TensorCores get work.
    if M <= 16:
        tm = M
    else:
        tm = min(1024, max(16, _round_up(pl.cdiv(M, 2), 16)))

    def _vmem_est(tm_, tn_):
        return (2 * tm_ * K * 2        # patches tile (bf16, double-buffered)
                + 2 * K * tn_ * 2      # weight buffers (bf16)
                + 2 * tn_ * 4          # bias buffers (f32)
                + 2 * tm_ * tn_ * out_isz)

    while _vmem_est(tm, tn) > vmem_budget and tm > 64:
        tm = max(64, tm // 2)

    grid = (pl.cdiv(M, tm), pl.cdiv(E, tn))

    cost = pl.CostEstimate(
        flops=2 * M * K * E,
        transcendentals=0,
        bytes_accessed=M * K * 2 + K * E * 2 + E * 4 + M * E * out_isz,
    )

    out = pl.pallas_call(
        _patch_embed_kernel,
        out_shape=jax.ShapeDtypeStruct((M, E), out_dtype),
        grid_spec=pltpu.PrefetchScalarGridSpec(
            num_scalar_prefetch=0,
            grid=grid,
            in_specs=[
                pl.BlockSpec((tm, K), lambda i, j: (i, 0)),   # streamed patches
                pl.BlockSpec((K, tn), lambda i, j: (0, j)),   # VMEM-resident (j == 1)
                pl.BlockSpec((1, tn), lambda i, j: (0, j)),   # VMEM-resident (j == 1)
            ],
            out_specs=pl.BlockSpec((tm, tn), lambda i, j: (i, j)),
        ),
        compiler_params=pltpu.CompilerParams(
            dimension_semantics=("parallel", "parallel"),
            allow_input_fusion=[True, False, False],
            vmem_limit_bytes=min(64 << 20, max(32 << 20, int(_vmem_est(tm, tn) * 1.5))),
        ),
        cost_estimate=cost,
    )(patches, w_flat, b_row)

    return out.reshape(B, num_patches, E)


class PatchEmbedPallas:
    """JAX/Pallas equivalent of timm/ConViT PatchEmbed (Conv2d, kernel == stride).

    Note: the projection runs in bf16 on the MXU (f32 accumulation) and the
    output defaults to bf16 (dominant HBM stream); pass out_dtype=jnp.float32
    for dtype parity with the f32 PyTorch Conv2d output.
    """

    def __init__(self, img_size=16, patch_size=4, in_chans=4, embed_dim=32,
                 out_dtype=jnp.bfloat16, key=None):
        self.img_size = (img_size, img_size)
        self.patch_size = (patch_size, patch_size)
        self.num_patches = (img_size // patch_size) * (img_size // patch_size)
        self.out_dtype = out_dtype
        key = key if key is not None else jax.random.PRNGKey(0)
        kw, kb = jax.random.split(key)
        # Deterministic synthetic init (PatchEmbed._init_weights does not touch Conv2d).
        self.weight = (
            jax.random.normal(kw, (embed_dim, in_chans, patch_size, patch_size), jnp.float32)
            * 0.02
        )
        self.bias = jax.random.normal(kb, (embed_dim,), jnp.float32) * 0.02

    def __call__(self, x):
        B, C, H, W = x.shape
        assert H == self.img_size[0] and W == self.img_size[1], (
            f"Input image size ({H}*{W}) doesn't match model "
            f"({self.img_size[0]}*{self.img_size[1]})."
        )
        return patch_embed_forward(
            x, self.weight, self.bias,
            patch_size=self.patch_size, out_dtype=self.out_dtype,
        )


def _reference(x, weight, bias, patch_size):
    ref = jax.lax.conv_general_dilated(
        x, weight, window_strides=patch_size, padding="VALID",
        dimension_numbers=("NCHW", "OIHW", "NCHW"),
    ) + bias[None, :, None, None]
    B, E = x.shape[0], weight.shape[0]
    return ref.reshape(B, E, -1).transpose(0, 2, 1)


if __name__ == "__main__":
    key = jax.random.PRNGKey(0)
    kx, kp, kx2, kp2 = jax.random.split(key, 4)

    # Toy config matching the module usage (B=2, C=4, 16x16, patch 4, E=32).
    B, C, H, W = 2, 4, 16, 16
    patch_size, embed_dim = 4, 32

    x = jax.random.normal(kx, (B, C, H, W), jnp.float32)
    model = PatchEmbedPallas(
        img_size=H, patch_size=patch_size, in_chans=C, embed_dim=embed_dim, key=kp
    )
    out = jax.block_until_ready(model(x))
    assert out.shape == (B, model.num_patches, embed_dim), out.shape

    ref = _reference(x, model.weight, model.bias, model.patch_size)
    assert jnp.allclose(out.astype(jnp.float32), ref, atol=2e-2, rtol=2e-2), float(
        jnp.max(jnp.abs(out.astype(jnp.float32) - ref))
    )

    # Larger config exercising multi-block M grid and an E that is a multiple of 128.
    B2, C2, H2, W2, ps2, E2 = 16, 3, 32, 32, 4, 384
    x2 = jax.random.normal(kx2, (B2, C2, H2, W2), jnp.float32)
    model2 = PatchEmbedPallas(img_size=H2, patch_size=ps2, in_chans=C2, embed_dim=E2, key=kp2)
    out2 = jax.block_until_ready(model2(x2))
    assert out2.shape == (B2, model2.num_patches, E2), out2.shape
    ref2 = _reference(x2, model2.weight, model2.bias, model2.patch_size)
    assert jnp.allclose(out2.astype(jnp.float32), ref2, atol=2e-2, rtol=2e-2), float(
        jnp.max(jnp.abs(out2.astype(jnp.float32) - ref2))
    )

    print("KERNEL_OK")
</pallas_src>

<mosaic_0001>
module attributes {stable_mosaic.version = 11 : i64} {
  func.func @_patch_embed_kernel(%arg0: i32, %arg1: i32, %arg2: memref<16x64xbf16, #tpu.memory_space<vmem>>, %arg3: memref<64x32xbf16, #tpu.memory_space<vmem>>, %arg4: memref<1x32xf32, #tpu.memory_space<vmem>>, %arg5: memref<16x32xbf16, #tpu.memory_space<vmem>>) attributes {dimension_semantics = [#tpu.dimension_semantics<parallel>, #tpu.dimension_semantics<parallel>], iteration_bounds = array<i64: 2, 1>, scalar_prefetch = 0 : i64, scratch_operands = 0 : i64, tpu.core_type = #tpu.core_type<tc>, window_params = [{transform_indices = @transform_0, window_bounds = array<i64: 16, 64>}, {transform_indices = @transform_1, window_bounds = array<i64: 64, 32>}, {transform_indices = @transform_2, window_bounds = array<i64: 1, 32>}, {transform_indices = @transform_3, window_bounds = array<i64: 16, 32>}]} {
    %c0 = arith.constant 0 : index
    %c0_0 = arith.constant 0 : index
    %0 = vector.load %arg2[%c0, %c0_0] : memref<16x64xbf16, #tpu.memory_space<vmem>>, vector<16x64xbf16>
    %c0_1 = arith.constant 0 : index
    %c0_2 = arith.constant 0 : index
    %1 = vector.load %arg3[%c0_1, %c0_2] : memref<64x32xbf16, #tpu.memory_space<vmem>>, vector<64x32xbf16>
    %cst = arith.constant dense<0.000000e+00> : vector<16x32xf32>
    %2 = tpu.matmul %0, %1, %cst {dimension_numbers = #tpu.dot_dimension_numbers<[1], [0], [0], [1], [0, 0, 1, 1], [], []>} : vector<16x64xbf16>, vector<64x32xbf16>, vector<16x32xf32> -> vector<16x32xf32>
    %c0_3 = arith.constant 0 : index
    %c0_4 = arith.constant 0 : index
    %3 = vector.load %arg4[%c0_3, %c0_4] : memref<1x32xf32, #tpu.memory_space<vmem>>, vector<1x32xf32>
    %4 = vector.broadcast %3 : vector<1x32xf32> to vector<16x32xf32>
    %5 = arith.addf %2, %4 : vector<16x32xf32>
    %6 = arith.truncf %5 : vector<16x32xf32> to vector<16x32xbf16>
    %c0_5 = arith.constant 0 : index
    %c0_6 = arith.constant 0 : index
    %7 = vector.load %arg5[%c0_5, %c0_6] : memref<16x32xbf16, #tpu.memory_space<vmem>>, vector<16x32xbf16>
    tpu.vector_store %arg5[%c0_5, %c0_6], %6 {strides = array<i32>} : memref<16x32xbf16, #tpu.memory_space<vmem>>, vector<16x32xbf16>,
    return
  }
  func.func @transform_0(%arg0: i32, %arg1: i32) -> (i32, i32) {
    %c0_i32 = arith.constant 0 : i32
    %c0_i32_0 = arith.constant 0 : i32
    return %arg0, %c0_i32 : i32, i32
  }
  func.func @transform_1(%arg0: i32, %arg1: i32) -> (i32, i32) {
    %c0_i32 = arith.constant 0 : i32
    %c0_i32_0 = arith.constant 0 : i32
    return %c0_i32, %arg1 : i32, i32
  }
  func.func @transform_2(%arg0: i32, %arg1: i32) -> (i32, i32) {
    %c0_i32 = arith.constant 0 : i32
    %c0_i32_0 = arith.constant 0 : i32
    return %c0_i32, %arg1 : i32, i32
  }
  func.func @transform_3(%arg0: i32, %arg1: i32) -> (i32, i32) {
    %c0_i32 = arith.constant 0 : i32
    return %arg0, %arg1 : i32, i32
  }
}

</mosaic_0001>

<bundles_post_ra>
// kernel: patch_embed_forward.1
= control target key start
LH: loop header
LB: loop body
LE: loop exit
PB: predicated region body
PF: predicated region fallthrough
CT: control target
= control target key end

     0   :  { %8 = vsyncpa [#allocation3], 0  ;;  %s776_s0 = inlined_call_operand.vmem [shape: bf16[32,64], index: 0, kind: input, shape index: {}]   ;;  %s777_s1 = inlined_call_operand.vmem [shape: bf16[64,32], index: 1, kind: input, shape index: {}]   ;;  %s778_s2 = inlined_call_operand.vmem [shape: f32[1,32], index: 2, kind: input, shape index: {}]   ;;  %s779_s3 = inlined_call_operand.hbm [shape: bf16[32,32], index: 3, kind: output, shape index: {}]  }
   0x1   :  { %10 = vsyncpa [#allocation3 + $0x1], 0  ;;  %s647_s12 = smov 0   ;;  %s649_s13 = smov 0  }
   0x2   :  { %s651_s14 = smov 0   ;;  %s653_s15 = smov 0  }
   0x3   :  { %s655_s16 = smov 0   ;;  %s657_s17 = smov 0  }
   0x4 LB: > { %s434_s18 = sadd.s32 4294967295, %s620_s17   ;;  %s435_s19 = sadd.s32 4294967294, %s620_s17   ;;  %s620_s17 = sphi %s657_s17, %s16_s17   ;;  %s616_s16 = sphi %s655_s16, %s786_s16   ;;  %s612_s15 = sphi %s653_s15, %s785_s15   ;;  %s608_s14 = sphi %s651_s14, %s784_s14   ;;  %s604_s13 = sphi %s649_s13, %s783_s13   ;;  %s600_s12 = sphi %s647_s12, %s782_s12  }
   0x5   : > { %s28_s20 = sadd.s32 1, %s616_s16  ;;  %s115_s21 = sadd.s32 1, %s608_s14 }
   0x6   : > { %p30_p0 = scmp.ge.s32.totalorder %s28_s20, 2  ;;  %p125_p1 = scmp.ne.s32.totalorder %s608_s14, %s604_s13 }
   0x7   : > { %p126_p2 = scmp.eq.s32.totalorder %s434_s18, 1  ;;  %p131_p3 = scmp.ne.s32.totalorder %s604_s13, %s600_s12 }
   0x8   : > { %s788_s20 = smov (%p30_p0, %s28_s20), 0  ;;  %p132_p5 = scmp.eq.s32.totalorder %s435_s19, 1 }
   0x9   : > { %p687_p4 = por %p126_p2, %p125_p1  ;;  %s110_s23 = ssub.s32 %s616_s16, %s788_s20 }
   0xa   : > { %p440_p6 = scmp.ge.s32.totalorder %s620_s17, 1  ;;  %p113_p7 = scmp.eq.s32.totalorder %s110_s23, 0 }
   0xb   : > { %p694_p8 = por %p132_p5, %p131_p3  ;;  %p172_p9 = scmp.lt.s32.totalorder %s620_s17, 3 }
   0xc   : > { %s700_s25 = scalar_select %p113_p7, %s608_s14, %s115_s21  }
   0xd   : > { %p173_p10 = pnand %p440_p6, %p172_p9 }
   0xe   : > { %v537_v0 = vld [vmem:[%s777_s1] sm:$0xff] (!%p173_p10)   ;;  %v622_v1 = vmov (!%p173_p10), 0.0   ;;  %v538_v2 = vld [vmem:[%s777_s1 + $0x8] sm:$0xff] (!%p173_p10)   ;;  %vm623_vm0 = vmmov (!%p173_p10), 0   ;;  %s442_s30 = sshll.u32 (!%p173_p10), %s612_s15, 1  ;;  %v539_v3 = vld [vmem:[%s777_s1 + $0x10] sm:$0xff] (!%p173_p10)  }
   0xf   : > { %176 = sbr.rel (%p173_p10) target bundleno = 264 (0x108), region = 32  ;;  %466 = vmatprep.subr.bf16.mxu0 (!%p173_p10), %v622_v1  ;;  %474 = vmatprep.mubr.msk.bf16.mxu0 (!%p173_p10), %vm623_vm0, %v622_v1  ;;  %p204_p11 = scmp.lt.s32.totalorder (!%p173_p10), %s442_s30, 3  ;;  %v540_v4 = vld [vmem:[%s777_s1 + $0x18] sm:$0xff] (!%p173_p10)   ;;  %vm264_vm1 = vcmask (!%p173_p10), 523264   ;;  %v444_v6 = vld [vmem:[%s778_s2] ss:$0 sm:$0xff] (!%p173_p10) }
  0x10   : > { %467 = vmatpush3.bf16.msra.mxu0 (!%p173_p10), %v537_v0  ;;  %s200_s18 = sand.u32 (!%p173_p10), 1, %s604_s13   ;;  %s460_s28 = sshll.u32 (!%p173_p10), %s612_s15, 7  ;;  %vm317_vm2 = vcmask (!%p173_p10), 257024  }
  0x11   : > { %468 = vmatprep.subr.bf16.mxu0 (!%p173_p10), %v622_v1  ;;  %s441_s19 = sshll.u32 (!%p173_p10), %s200_s18, 3  ;;  %s728_s4 = scalar_lea.hbm (!%p173_p10), %s779_s3, %s460_s28 }
  0x12   : > { %s202_s26 = scalar_lea.vmem (!%p173_p10), [#allocation2], %s441_s19  ;;  %s730_s5 = scalar_lea.sflag (!%p173_p10), [#allocation3], %s200_s18 }
  0x13   : > { %s335_s27 = sshll.u32 (!%p173_p10), %s202_s26, 4  ;;  %s723_s27 = int_to_ptr.vmem [resolvable:$true] %s335_s27 }
  0x14   : > { %469 = vmatpush3.bf16.msra.mxu0 (!%p173_p10), %v538_v2  ;;  %s542_s15 = scalar_lea.vmem (!%p173_p10), %s723_s27, 128 }
  0x15   : > { %470 = vmatprep.subr.bf16.mxu0 (!%p173_p10), %v622_v1  ;;  %p543_p12 = scmp.ne.s32.totalorder (!%p173_p10), %s723_s27, %s542_s15 }
  0x16   : > { %s790_s30 = smov (!%p204_p11, %s442_s30), 3 }
  0x17   : > { %s443_s6 = sshll.u32 %s790_s30, 2  ;;  %p544_p13 = pnand %p543_p12, %p687_p4 }
  0x18   : > { %s207_s9 = scalar_lea.vmem %s776_s0, %s443_s6  ;;  %471 = vmatpush3.bf16.msra.mxu0 %v539_v3  ;;  %s624_s6 = smov [#allocation2]  }
  0x19   : > { %472 = vmatprep.subr.bf16.mxu0 %v622_v1  ;;  %v541_v5 = vld [vmem:[%s207_s9] sm:$0xff]   ;;  %p545_p0 = pneg %p544_p13  ;;  %s546_s7 = sshll.u32 %s624_s6, 4  ;;  %s547_s7 = int_to_ptr.vmem [resolvable:$false] %s546_s7 }
  0x1a   : > { %s548_s8 = scalar_lea.vmem %s547_s7, 256  ;;  %p549_p1 = scmp.lt.s32.totalorder %s723_s27, %s547_s7 }
  0x1b   : > { %p550_p2 = scmp.lt.s32.totalorder %s548_s8, %s542_s15 }
  0x1c   : > { %473 = vmatpush3.bf16.msra.mxu0 %v540_v4 }
  0x1d   : > { %p551_p3 = por %p550_p2, %p549_p1 }
  0x1f   : > { %475 = vmatmul.mubr.msk.bf16.vlgmr.msra.gmra.mrb[0].mxu0 %vm264_vm1, %v541_v5  ;;  %p552_p5 = pnand %p551_p3, %p545_p0 }
  0xf2   : > { %v302_v7 = vpop.f32.mrb[0].mxu0 }
  0xf3   : > { %v303_v8 = vadd.f32 %v444_v6, %v302_v7  ;;  %v476_v9 = vpop.f32.mrb[1].mxu0 }
  0xf4   : > { %v305_v10 = vpop.f32.mrb[2].mxu0 }
  0xf5   : > { %v458_v11 = vpack.c.bf16 %v303_v8, %v303_v8  ;;  %v306_v12 = vadd.f32 %v444_v6, %v305_v10  ;;  %v477_v13 = vpop.f32.mrb[3].mxu0 }
  0xf7   : > { %318 = vst.msk [vmem:[%s202_s26] sm:$0xf] %vm317_vm2, %v458_v11  ;;  %v459_v14 = vpack.c.bf16 %v306_v12, %v306_v12 }
  0xf9   : > { %319 = vst.msk [vmem:[%s202_s26 + $0x4] sm:$0xf] %vm317_vm2, %v459_v14 }
  0xfa   : > { %555 = shalt.err (!%p552_p5)
}
  0xfb   : > { %s556_s9 = scalar_lea.hbm %s728_s4, 128  ;;  %s560_s18 = scalar_lea.hbm %s779_s3, 256 }
  0xfc   : > { %p557_p6 = scmp.ne.s32.totalorder %s728_s4, %s556_s9  ;;  %p561_p10 = scmp.lt.u32.totalorder %s728_s4, %s779_s3 }
  0xfd   : > { %p562_p11 = scmp.lt.u32.totalorder %s560_s18, %s556_s9  ;;  %p564_p13 = scmp.lt.u32.totalorder %s556_s9, %s728_s4 }
  0xfe   : > { %p558_p7 = pnand %p557_p6, %p687_p4 }
  0xff   : > { %p563_p12 = por %p562_p11, %p561_p10 }
 0x100   : > { %p559_p9 = pneg %p558_p7 }
 0x101   : > { %p565_p0 = por %p564_p13, %p563_p12 }
 0x103   : > { %p566_p1 = pnand %p565_p0, %p559_p9 }
 0x105   : > { %569 = shalt.err (!%p566_p1)
}
 0x106   : > { %s625_s23 = smov 64   ;;  %s626_s26 = smov 4  }
 0x107   : > { %478 = dma.vmem_to_hbm [thread:$0]  (%p687_p4), %s723_s27, 128, %s728_s4, %s730_s5, %s625_s23, %s625_s23, %s626_s26  }
 0x108 PF: > { %p484_p2 = scmp.ge.s32.totalorder %s620_s17, 2  ;;  %s350_s28 = sand.u32 1, %s600_s12  }
 0x109   : > { %s351_s29 = scalar_lea.sflag [#allocation3], %s350_s28 }
 0x10a   : > { %p481_p3 = pnand %p484_p2, %p694_p8 }
 0x10c   : > { %595 = dma.done.wait (!%p481_p3), %s351_s29, 128  }
 0x10d   : > { %597 = vsyncadd (!%p481_p3), %s351_s29, 4294967168  ;;  %s16_s17 = sadd.s32 1, %s620_s17   ;;  %s782_s12 = smov %s604_s13 }
 0x10e   : > { %p13_p5 = scmp.ge.s32.totalorder %s16_s17, 4   ;;  %s783_s13 = smov %s608_s14 }
 0x10f   : > { %s784_s14 = smov %s700_s25  ;;  %s785_s15 = smov %s616_s16 }
 0x110   : > { %s786_s16 = smov %s788_s20  ;;  %15 = sbr.rel (!%p13_p5) target bundleno = 4 (0x4), region = 73 }
 0x117   :  { %356 = vsyncpa [#allocation3], 1 }
 0x118   :  { %358 = vsyncpa [#allocation3 + $0x1], 1 }

</bundles_post_ra>
